<compile_context>
chip_gen: v7x
topology: tpu7x:2x2x1
jax: 0.10.0
libtpu: 0.0.40
codegen_flags: <defaults>
</compile_context>

<pallas_src>
import functools
from math import sqrt

import jax
import jax.numpy as jnp
from jax import lax
from jax.experimental import pallas as pl
from jax.experimental.pallas import tpu as pltpu


def _round_up(x, m):
    return ((x + m - 1) // m) * m


# Cap tiles at 512: double-buffered f32 VMEM use is then
# 2 * (tm*tk + tn*tk + tm*tn) * 4B ~= 6.3 MiB, which fits the scoped-VMEM
# defaults on every generation (and leaves headroom on v7x's 64 MiB).
_MAX_TILE = 512


def _pick_m_tile(dim):
    """Tile for a second-to-last-dim axis (must be multiple of 8 or full dim)."""
    if dim <= _MAX_TILE:
        return dim, dim  # full-dim block, no padding
    # Balanced tiles so B slightly over a boundary doesn't double the M work.
    t = _round_up(pl.cdiv(dim, pl.cdiv(dim, _MAX_TILE)), 8)
    return t, _round_up(dim, t)


def _pick_lane_tile(dim):
    """Tile for a last-dim axis (must be multiple of 128 or full dim)."""
    if dim <= _MAX_TILE:
        return dim, dim  # full-dim block, no padding
    for t in (512, 384, 256, 128):
        if dim % t == 0:
            return t, dim  # divides exactly, no padding / no weight copy
    padded = _round_up(dim, 128)
    for t in (512, 384, 256, 128):
        if padded % t == 0:
            return t, padded
    return 128, padded


def _kernel_inplace(x_ref, w_ref, b_ref, o_ref, *, scale, bf16):
    """f32 output: accumulate directly into the resident o_ref block."""
    k = pl.program_id(2)

    @pl.when(k == 0)
    def _init():
        o_ref[...] = jnp.zeros_like(o_ref)

    x = x_ref[...]
    if bf16:
        x = x.astype(jnp.bfloat16)
    # Contract in_dim of x (axis 1) with in_dim of W (axis 1):
    # (tm, tk) x (tn, tk) -> (tm, tn). No transposed copy of W is materialized.
    o_ref[...] += lax.dot_general(
        x,
        w_ref[...],
        dimension_numbers=(((1,), (1,)), ((), ())),
        preferred_element_type=jnp.float32,
    )

    @pl.when(k == pl.num_programs(2) - 1)
    def _finalize():
        # Single FMA applies the equalized-LR scale and the bias once per
        # output tile (hoisted out of the K loop).
        o_ref[...] = o_ref[...] * scale + b_ref[...].astype(jnp.float32)


def _kernel_scratch(x_ref, w_ref, b_ref, o_ref, acc_ref, *, scale, bf16):
    """Non-f32 output: accumulate in an f32 VMEM scratch, cast at finalize."""
    k = pl.program_id(2)

    @pl.when(k == 0)
    def _init():
        acc_ref[...] = jnp.zeros_like(acc_ref)

    x = x_ref[...]
    if bf16:
        x = x.astype(jnp.bfloat16)
    acc_ref[...] += lax.dot_general(
        x,
        w_ref[...],
        dimension_numbers=(((1,), (1,)), ((), ())),
        preferred_element_type=jnp.float32,
    )

    @pl.when(k == pl.num_programs(2) - 1)
    def _finalize():
        o_ref[...] = (
            acc_ref[...] * scale + b_ref[...].astype(jnp.float32)
        ).astype(o_ref.dtype)


def equal_linear(x, weight_orig, bias, *, use_bf16_matmul=False):
    """x: (B, in_dim); weight_orig: (out_dim, in_dim); bias: (out_dim,)."""
    B, in_dim = x.shape
    out_dim, in_dim_w = weight_orig.shape
    assert in_dim == in_dim_w
    assert bias.shape == (out_dim,)
    scale = sqrt(2.0 / in_dim)  # fan_in = in_dim for nn.Linear weight

    tm, Mp = _pick_m_tile(B)
    tn, Np = _pick_lane_tile(out_dim)
    tk, Kp = _pick_lane_tile(in_dim)

    # Pad only when a dimension isn't a tile multiple (zero K-pad contributes
    # 0 to the dot; padded M/N rows/cols are sliced away below). For common
    # shapes (dims <= 512 or multiples of 128) no padded weight copy is made.
    x_p = x
    if Mp != B or Kp != in_dim:
        x_p = jnp.pad(x, ((0, Mp - B), (0, Kp - in_dim)))
    w_p = weight_orig
    if Np != out_dim or Kp != in_dim:
        w_p = jnp.pad(weight_orig, ((0, Np - out_dim), (0, Kp - in_dim)))
    if use_bf16_matmul:
        w_p = w_p.astype(jnp.bfloat16)  # halves weight DMA volume
    b_p = bias.reshape(1, out_dim)
    if Np != out_dim:
        b_p = jnp.pad(b_p, ((0, 0), (0, Np - out_dim)))

    grid = (Mp // tm, Np // tn, Kp // tk)

    in_specs = [
        pl.BlockSpec((tm, tk), lambda i, j, k: (i, k)),  # x tile
        pl.BlockSpec((tn, tk), lambda i, j, k: (j, k)),  # W tile (out, in)
        pl.BlockSpec((1, tn), lambda i, j, k: (0, j)),   # bias tile
    ]
    out_spec = pl.BlockSpec((tm, tn), lambda i, j, k: (i, j))

    if x.dtype == jnp.float32:
        kernel = functools.partial(
            _kernel_inplace, scale=scale, bf16=use_bf16_matmul)
        scratch = []
    else:
        kernel = functools.partial(
            _kernel_scratch, scale=scale, bf16=use_bf16_matmul)
        scratch = [pltpu.VMEM((tm, tn), jnp.float32)]

    out_p = pl.pallas_call(
        kernel,
        out_shape=jax.ShapeDtypeStruct((Mp, Np), x.dtype),
        grid_spec=pltpu.PrefetchScalarGridSpec(
            num_scalar_prefetch=0,
            grid=grid,
            in_specs=in_specs,
            out_specs=out_spec,
            scratch_shapes=scratch,
        ),
        compiler_params=pltpu.CompilerParams(
            dimension_semantics=("parallel", "parallel", "arbitrary")
        ),
    )(x_p, w_p, b_p)

    if Mp != B or Np != out_dim:
        out_p = out_p[:B, :out_dim]
    return out_p


if __name__ == "__main__":
    key = jax.random.PRNGKey(0)
    k_x, k_w = jax.random.split(key)

    B, in_dim, out_dim = 8, 32, 32

    x = jax.random.normal(k_x, (B, in_dim), dtype=jnp.float32)
    # Deterministic parameter init mirroring the module's __init__:
    #   linear.weight.data.normal_()  -> standard normal
    #   linear.bias.data.zero_()      -> zeros
    weight_orig = jax.random.normal(k_w, (out_dim, in_dim), dtype=jnp.float32)
    bias = jnp.zeros((out_dim,), dtype=jnp.float32)

    out = jax.block_until_ready(equal_linear(x, weight_orig, bias))

    # Reference check (plain JAX) to validate semantics.
    scale = sqrt(2.0 / in_dim)
    ref = x @ (weight_orig * scale).T + bias
    assert out.shape == (B, out_dim)
    assert jnp.allclose(out, ref, atol=1e-5, rtol=1e-5)

    print("KERNEL_OK")
</pallas_src>

<mosaic_0001>
module attributes {stable_mosaic.version = 11 : i64} {
  func.func @_kernel_inplace(%arg0: i32, %arg1: i32, %arg2: i32, %arg3: memref<8x32xf32, #tpu.memory_space<vmem>>, %arg4: memref<32x32xf32, #tpu.memory_space<vmem>>, %arg5: memref<1x32xf32, #tpu.memory_space<vmem>>, %arg6: memref<8x32xf32, #tpu.memory_space<vmem>>) attributes {dimension_semantics = [#tpu.dimension_semantics<parallel>, #tpu.dimension_semantics<parallel>, #tpu.dimension_semantics<arbitrary>], iteration_bounds = array<i64: 1, 1, 1>, scalar_prefetch = 0 : i64, scratch_operands = 0 : i64, tpu.core_type = #tpu.core_type<tc>, window_params = [{transform_indices = @transform_0, window_bounds = array<i64: 8, 32>}, {transform_indices = @transform_1, window_bounds = array<i64: 32, 32>}, {transform_indices = @transform_2, window_bounds = array<i64: 1, 32>}, {transform_indices = @transform_3, window_bounds = array<i64: 8, 32>}]} {
    %c0_i32 = arith.constant 0 : i32
    %0 = arith.cmpi eq, %arg2, %c0_i32 : i32
    %1 = arith.extui %0 : i1 to i32
    %c0_i32_0 = arith.constant 0 : i32
    %2 = arith.cmpi ne, %1, %c0_i32_0 : i32
    scf.if %2 {
      %cst_10 = arith.constant 0.000000e+00 : f32
      %12 = vector.broadcast %cst_10 : f32 to vector<8x32xf32>
      %c0_11 = arith.constant 0 : index
      %c0_12 = arith.constant 0 : index
      %13 = vector.load %arg6[%c0_11, %c0_12] : memref<8x32xf32, #tpu.memory_space<vmem>>, vector<8x32xf32>
      tpu.vector_store %arg6[%c0_11, %c0_12], %12 {strides = array<i32>} : memref<8x32xf32, #tpu.memory_space<vmem>>, vector<8x32xf32>,
    } else {
    }
    %c0 = arith.constant 0 : index
    %c0_1 = arith.constant 0 : index
    %3 = vector.load %arg3[%c0, %c0_1] : memref<8x32xf32, #tpu.memory_space<vmem>>, vector<8x32xf32>
    %c0_2 = arith.constant 0 : index
    %c0_3 = arith.constant 0 : index
    %4 = vector.load %arg6[%c0_2, %c0_3] : memref<8x32xf32, #tpu.memory_space<vmem>>, vector<8x32xf32>
    %c0_4 = arith.constant 0 : index
    %c0_5 = arith.constant 0 : index
    %5 = vector.load %arg4[%c0_4, %c0_5] : memref<32x32xf32, #tpu.memory_space<vmem>>, vector<32x32xf32>
    %cst = arith.constant dense<0.000000e+00> : vector<8x32xf32>
    %6 = tpu.matmul %3, %5, %cst {dimension_numbers = #tpu.dot_dimension_numbers<[1], [1], [0], [0], [0, 0, 1, 0], [], []>} : vector<8x32xf32>, vector<32x32xf32>, vector<8x32xf32> -> vector<8x32xf32>
    %7 = arith.addf %4, %6 : vector<8x32xf32>
    %c0_6 = arith.constant 0 : index
    %c0_7 = arith.constant 0 : index
    %8 = vector.load %arg6[%c0_6, %c0_7] : memref<8x32xf32, #tpu.memory_space<vmem>>, vector<8x32xf32>
    tpu.vector_store %arg6[%c0_6, %c0_7], %7 {strides = array<i32>} : memref<8x32xf32, #tpu.memory_space<vmem>>, vector<8x32xf32>,
    %c0_i32_8 = arith.constant 0 : i32
    %9 = arith.cmpi eq, %arg2, %c0_i32_8 : i32
    %10 = arith.extui %9 : i1 to i32
    %c0_i32_9 = arith.constant 0 : i32
    %11 = arith.cmpi ne, %10, %c0_i32_9 : i32
    scf.if %11 {
      %c0_10 = arith.constant 0 : index
      %c0_11 = arith.constant 0 : index
      %12 = vector.load %arg6[%c0_10, %c0_11] : memref<8x32xf32, #tpu.memory_space<vmem>>, vector<8x32xf32>
      %cst_12 = arith.constant 2.500000e-01 : f32
      %13 = vector.broadcast %cst_12 : f32 to vector<8x32xf32>
      %14 = arith.mulf %12, %13 : vector<8x32xf32>
      %c0_13 = arith.constant 0 : index
      %c0_14 = arith.constant 0 : index
      %15 = vector.load %arg5[%c0_13, %c0_14] : memref<1x32xf32, #tpu.memory_space<vmem>>, vector<1x32xf32>
      %16 = vector.broadcast %15 : vector<1x32xf32> to vector<8x32xf32>
      %17 = arith.addf %14, %16 : vector<8x32xf32>
      %c0_15 = arith.constant 0 : index
      %c0_16 = arith.constant 0 : index
      %18 = vector.load %arg6[%c0_15, %c0_16] : memref<8x32xf32, #tpu.memory_space<vmem>>, vector<8x32xf32>
      tpu.vector_store %arg6[%c0_15, %c0_16], %17 {strides = array<i32>} : memref<8x32xf32, #tpu.memory_space<vmem>>, vector<8x32xf32>,
    } else {
    }
    return
  }
  func.func @transform_0(%arg0: i32, %arg1: i32, %arg2: i32) -> (i32, i32) {
    %c0_i32 = arith.constant 0 : i32
    return %arg0, %arg2 : i32, i32
  }
  func.func @transform_1(%arg0: i32, %arg1: i32, %arg2: i32) -> (i32, i32) {
    %c0_i32 = arith.constant 0 : i32
    return %arg1, %arg2 : i32, i32
  }
  func.func @transform_2(%arg0: i32, %arg1: i32, %arg2: i32) -> (i32, i32) {
    %c0_i32 = arith.constant 0 : i32
    %c0_i32_0 = arith.constant 0 : i32
    return %c0_i32, %arg1 : i32, i32
  }
  func.func @transform_3(%arg0: i32, %arg1: i32, %arg2: i32) -> (i32, i32) {
    %c0_i32 = arith.constant 0 : i32
    return %arg0, %arg1 : i32, i32
  }
}

</mosaic_0001>

<bundles_post_ra>
// kernel: tpu_custom_call.1
= control target key start
LH: loop header
LB: loop body
LE: loop exit
PB: predicated region body
PF: predicated region fallthrough
CT: control target
= control target key end

     0   :  { %8 = vsyncpa [#allocation3], 0  ;;  %s361_s0 = inlined_call_operand.hbm [shape: f32[8,32], index: 0, kind: input, shape index: {}]   ;;  %s362_s1 = inlined_call_operand.hbm [shape: f32[32,32], index: 1, kind: input, shape index: {}]   ;;  %s363_s2 = inlined_call_operand.vmem [shape: f32[1,32], index: 2, kind: input, shape index: {}]   ;;  %s364_s3 = inlined_call_operand.hbm [shape: f32[8,32], index: 3, kind: output, shape index: {}]  }
   0x1   :  { %9 = vsyncpa [#allocation6], 0 }
   0x2   :  { %10 = vsyncpa [#allocation4], 0  ;;  %s281_s12 = smov [#allocation2]   ;;  %s282_s14 = smov [#allocation5]  }
   0x3   :  { %s17_s13 = sshll.u32 %s281_s12, 4  ;;  %s26_s15 = sshll.u32 %s282_s14, 4  ;;  %s18_s13 = int_to_ptr.vmem [resolvable:$true] %s17_s13  ;;  %s309_s15 = int_to_ptr.vmem [resolvable:$true] %s26_s15 }
   0x4   :  { %s209_s18 = scalar_lea.hbm %s361_s0, 128 }
   0x5   :  { %p210_p0 = scmp.ne.s32.totalorder %s361_s0, %s209_s18  ;;  %p213_p1 = scmp.lt.u32.totalorder %s209_s18, %s361_s0 }
   0x7   :  { %p215_p2 = pnand %p213_p1, %p210_p0 }
   0x9   :  { %218 = shalt.err (!%p215_p2)
}
   0xa   :  { %s219_s23 = scalar_lea.vmem %s18_s13, 128  ;;  %p224_p4 = scmp.lt.s32.totalorder %s18_s13, %s18_s13 }
   0xb   :  { %p220_p3 = scmp.ne.s32.totalorder %s18_s13, %s219_s23  ;;  %p225_p5 = scmp.lt.s32.totalorder %s219_s23, %s219_s23 }
   0xd   :  { %p226_p6 = por %p225_p5, %p224_p4 }
   0xf   :  { %p227_p7 = pnand %p226_p6, %p220_p3 }
  0x11   :  { %230 = shalt.err (!%p227_p7)
}
  0x12   :  { %20 = dma.hbm_to_vmem [thread:$0]  %s361_s0, 128, %s18_s13, [#allocation3]  }
  0x13   :  { %s231_s28 = scalar_lea.hbm %s362_s1, 512 }
  0x14   :  { %p232_p8 = scmp.ne.s32.totalorder %s362_s1, %s231_s28  ;;  %p235_p9 = scmp.lt.u32.totalorder %s231_s28, %s362_s1 }
  0x16   :  { %p237_p10 = pnand %p235_p9, %p232_p8 }
  0x18   :  { %240 = shalt.err (!%p237_p10)
}
  0x19   :  { %s241_s6 = scalar_lea.vmem %s309_s15, 512  ;;  %p246_p12 = scmp.lt.s32.totalorder %s309_s15, %s309_s15 }
  0x1a   :  { %p242_p11 = scmp.ne.s32.totalorder %s309_s15, %s241_s6  ;;  %p247_p13 = scmp.lt.s32.totalorder %s241_s6, %s241_s6 }
  0x1c   :  { %p248_p0 = por %p247_p13, %p246_p12 }
  0x1e   :  { %p249_p1 = pnand %p248_p0, %p242_p11 }
  0x20   :  { %252 = shalt.err (!%p249_p1)
}
  0x21   :  { %s283_s0 = smov 128   ;;  %s284_s7 = smov 8  }
  0x22   :  { %32 = dma.hbm_to_vmem [thread:$0]  %s362_s1, 512, %s309_s15, [#allocation6], %s283_s0, %s283_s0, %s284_s7  }
  0x23   :  { %275 = dma.done.wait [#allocation3], 128  }
  0x24   :  { %276 = vsyncadd [#allocation3], 4294967168 }
  0x25   :  { %277 = dma.done.wait [#allocation6], 512  }
  0x26   :  { %278 = vsyncadd [#allocation6], 4294966784  ;;  %vm45_vm0 = vcmask 261120   ;;  %v285_v0 = vmov 0.0|0.0   ;;  %v286_v1 = vmov 0.0   ;;  %vm287_vm1 = vmmov 0  }
  0x27   :  { %193 = vmatprep.subr.bf16.mxu0 %v285_v0  ;;  %46 = vst.msk [vmem:[#allocation7] sm:$0xff] %vm45_vm0, %v286_v1  ;;  %190 = vmatprep.mubr.msk.f32.mxu0 %vm287_vm1, %v286_v1  ;;  %v49_v2 = vld [vmem:[#allocation5] sm:$0xff]  ;;  %v50_v3 = vld [vmem:[#allocation5 + $0x8] sm:$0xff]  ;;  %vm195_vm2 = vmpackc.low %vm45_vm0, %vm45_vm0  ;;  %s288_s11 = smov [#allocation7]  }
  0x28   :  { %v194_v4 = vpack.c.bf16 %v50_v3, %v49_v2  ;;  %v51_v5 = vld [vmem:[#allocation5 + $0x10] sm:$0xff]  ;;  %v52_v6 = vld [vmem:[#allocation5 + $0x18] sm:$0xff]  ;;  %s161_s12 = sshll.u32 %s288_s11, 4  ;;  %s162_s12 = int_to_ptr.vmem [resolvable:$true] %s161_s12 }
  0x29   :  { %v198_v7 = vpack.c.bf16 %v52_v6, %v51_v5  ;;  %v47_v8 = vld [vmem:[#allocation2] sm:$0xff]  ;;  %s253_s13 = scalar_lea.vmem %s162_s12, 128  ;;  %p258_p3 = scmp.lt.s32.totalorder %s162_s12, %s162_s12 }
  0x2a   :  { %196 = vmatpush3.bf16.xpose.msk.msra.mxu0 %vm195_vm2, %v194_v4  ;;  %v176_v14 = vld [vmem:[%s363_s2] ss:$0 sm:$0xff]  ;;  %p254_p2 = scmp.ne.s32.totalorder %s162_s12, %s253_s13  ;;  %p259_p4 = scmp.lt.s32.totalorder %s253_s13, %s253_s13 }
  0x2b   :  { %197 = vmatprep.subr.bf16.mxu0 %v285_v0 }
  0x2c   :  { %p260_p5 = por %p259_p4, %p258_p3 }
  0x2e   :  { %v48_v9 = vld [vmem:[#allocation7] sm:$0xff]  ;;  %p261_p6 = pnand %p260_p5, %p254_p2 }
  0x32   :  { %200 = vmatpush3.bf16.xpose.msk.msra.mxu0 %vm195_vm2, %v198_v7 }
  0x39   :  { %191 = vmatmul.mubr.msk.f32.vlgmr.msra.gmra.mrb[0].mxu0 %vm45_vm0, %v47_v8 }
 0x10c   :  { %v135_v10 = vpop.f32.mrb[0].mxu0 }
 0x10d   :  { %v139_v11 = vadd.f32 %v135_v10, %v48_v9  ;;  %v192_v12 = vpop.f32.mrb[1].mxu0 }
 0x10f   :  { %140 = vst.msk [vmem:[#allocation7] sm:$0xff] %vm45_vm0, %v139_v11 }
 0x116   :  { %v144_v13 = vld [vmem:[#allocation7] sm:$0xff] }
 0x117   :  { %v145_v15 = vmul.f32 0.25, %v144_v13 }
 0x119   :  { %v153_v16 = vadd.f32 %v176_v14, %v145_v15 }
 0x11b   :  { %154 = vst.msk [vmem:[#allocation7] sm:$0xff] %vm45_vm0, %v153_v16 }
 0x11c   :  { %264 = shalt.err (!%p261_p6)
}
 0x11d   :  { %s265_s16 = scalar_lea.hbm %s364_s3, 128 }
 0x11e   :  { %p266_p7 = scmp.ne.s32.totalorder %s364_s3, %s265_s16  ;;  %p269_p8 = scmp.lt.u32.totalorder %s265_s16, %s364_s3 }
 0x120   :  { %p271_p9 = pnand %p269_p8, %p266_p7 }
 0x122   :  { %274 = shalt.err (!%p271_p9)
}
 0x123   :  { %164 = dma.vmem_to_hbm [thread:$0]  %s162_s12, 128, %s364_s3, [#allocation4]  }
 0x124   :  { %279 = dma.done.wait [#allocation4], 128  }
 0x125   :  { %280 = vsyncadd [#allocation4], 4294967168 }
 0x126   :  { %168 = vsyncpa [#allocation3], 1 }
 0x127   :  { %169 = vsyncpa [#allocation6], 1 }
 0x128   :  { %170 = vsyncpa [#allocation4], 1 }

</bundles_post_ra>
